<compile_context>
chip_gen: v7x
topology: tpu7x:2x2x1
jax: 0.10.0
libtpu: 0.0.40
codegen_flags: <defaults>
</compile_context>

<pallas_src>
import functools

import jax
import jax.numpy as jnp
from jax.experimental import pallas as pl
from jax.experimental.pallas import tpu as pltpu


def _round_up(n: int, m: int) -> int:
    return ((n + m - 1) // m) * m


def _mlp_fused_kernel(*refs, num_layers: int, alpha: float):
    """refs = (x_ref, w0, b0, w1, b1, ..., o_ref); all padded, all in VMEM."""
    x_ref = refs[0]
    o_ref = refs[-1]
    param_refs = refs[1:-1]

    inv_alpha = 1.0 / alpha          # python float -> baked into the trace
    h = x_ref[...]                   # [Bp, D0p] f32, already in vregs/VMEM
    for layer in range(num_layers):  # static unroll: the whole MLP in one kernel
        w = param_refs[2 * layer][...]      # [Dinp, Doutp]  (pre-transposed)
        b = param_refs[2 * layer + 1][...]  # [1, Doutp]
        # standard [M,K] x [K,N] contraction -> MXU, f32 accumulate
        y = jax.lax.dot_general(
            h, w,
            dimension_numbers=(((1,), (0,)), ((), ())),
            preferred_element_type=jnp.float32,
        ) + b
        if layer < num_layers - 1:
            # CELU(y) = y if y > 0 else alpha * (exp(y/alpha) - 1)
            # exp runs on the EUP slot; divide replaced by a multiply; single select.
            # TODO(synk): switch to jnp.expm1 once its Mosaic lowering is confirmed
            # on the target jax version (slightly better precision near 0).
            y = jnp.where(y > 0.0, y, alpha * (jnp.exp(y * inv_alpha) - 1.0))
        h = y
    o_ref[...] = h.astype(o_ref.dtype)


def init_mlp_params(key, dim_in, dim_out, dim_hidden=20, num_hidden=0):
    """Matches the PyTorch __init__: normal(0, 0.1) weights, uniform(-0.1, 0.1)
    biases.  Weights stored PyTorch-style as [out_features, in_features]."""
    if num_hidden == 0:
        dims = [(dim_in, dim_out)]
    elif num_hidden >= 1:
        dims = [(dim_in, dim_hidden)]
        dims += [(dim_hidden, dim_hidden)] * (num_hidden - 1)
        dims += [(dim_hidden, dim_out)]
    else:
        raise Exception('number of hidden layers must be positive')

    params = []
    for (d_in, d_out) in dims:
        key, kw, kb = jax.random.split(key, 3)
        w = 0.1 * jax.random.normal(kw, (d_out, d_in), dtype=jnp.float32)
        b = jax.random.uniform(kb, (d_out,), minval=-0.1, maxval=0.1,
                               dtype=jnp.float32)
        params.append((w, b))
    return params


def pack_params_for_kernel(params, lane: int = 128):
    """One-time host-side prep: transpose W to [Din, Dout] and zero-pad every
    feature dim up to a multiple of `lane`.  Returns (w0, b0, w1, b1, ...)."""
    packed = []
    for (w, b) in params:
        d_out, d_in = w.shape
        d_in_p, d_out_p = _round_up(d_in, lane), _round_up(d_out, lane)
        w_t = jnp.zeros((d_in_p, d_out_p), w.dtype).at[:d_in, :d_out].set(w.T)
        b_p = jnp.zeros((1, d_out_p), b.dtype).at[0, :d_out].set(b)
        packed += [w_t, b_p]
    return tuple(packed)


def mlp_forward(packed_params, x, dim_out: int, alpha: float = 1.0):
    """Run the whole MLP in a single fused pallas_call."""
    num_layers = len(packed_params) // 2
    batch, d_in = x.shape
    batch_p = _round_up(batch, 8)
    d_in_p = packed_params[0].shape[0]    # padded input width of layer 0
    d_out_p = packed_params[-2].shape[1]  # padded output width of last layer

    # Zero-pad the input once; padded lanes stay exactly zero through all layers.
    x_p = jnp.zeros((batch_p, d_in_p), x.dtype).at[:batch, :d_in].set(x)

    kernel = functools.partial(_mlp_fused_kernel,
                               num_layers=num_layers, alpha=alpha)
    vmem = pl.BlockSpec(memory_space=pltpu.MemorySpace.VMEM)
    out_p = pl.pallas_call(
        kernel,
        out_shape=jax.ShapeDtypeStruct((batch_p, d_out_p), x.dtype),
        # Tiny problem: no grid, whole (padded) arrays resident in VMEM
        # (total footprint is a few hundred KB — no pipelining machinery needed).
        in_specs=[vmem] * (1 + len(packed_params)),
        out_specs=vmem,
    )(x_p, *packed_params)
    return out_p[:batch, :dim_out]


def _celu_ref(z, alpha):
    return jnp.where(z > 0.0, z, alpha * jnp.expm1(z / alpha))


def _mlp_ref(params, x, alpha):
    h = x
    for (w, b) in params[:-1]:
        h = _celu_ref(h @ w.T + b, alpha)
    w, b = params[-1]
    return h @ w.T + b


if __name__ == "__main__":
    key = jax.random.PRNGKey(0)
    k_x, k_p = jax.random.split(key)

    batch, dim_in, dim_hidden, dim_out, num_hidden = 8, 16, 32, 8, 2
    x = jax.random.normal(k_x, (batch, dim_in), dtype=jnp.float32)
    params = init_mlp_params(k_p, dim_in, dim_out, dim_hidden=dim_hidden,
                             num_hidden=num_hidden)

    packed = pack_params_for_kernel(params)  # one-time transpose + pad

    ok = True
    for alpha in (1.0, 1.7):  # validate real alpha handling, not just alpha=1
        out = jax.block_until_ready(mlp_forward(packed, x, dim_out, alpha=alpha))
        ref = _mlp_ref(params, x, alpha)
        assert out.shape == (batch, dim_out)
        ok &= bool(jnp.allclose(out, ref, atol=1e-4, rtol=1e-4))
    assert ok
    print("KERNEL_OK")
</pallas_src>

<mosaic_0001>
module attributes {stable_mosaic.version = 11 : i64} {
  func.func @_mlp_fused_kernel(%arg0: memref<8x128xf32, #tpu.memory_space<vmem>>, %arg1: memref<128x128xf32, #tpu.memory_space<vmem>>, %arg2: memref<1x128xf32, #tpu.memory_space<vmem>>, %arg3: memref<128x128xf32, #tpu.memory_space<vmem>>, %arg4: memref<1x128xf32, #tpu.memory_space<vmem>>, %arg5: memref<128x128xf32, #tpu.memory_space<vmem>>, %arg6: memref<1x128xf32, #tpu.memory_space<vmem>>, %arg7: memref<8x128xf32, #tpu.memory_space<vmem>>) attributes {dimension_semantics = [], scalar_prefetch = 0 : i64, scratch_operands = 0 : i64, tpu.core_type = #tpu.core_type<tc>} {
    %c0 = arith.constant 0 : index
    %c0_0 = arith.constant 0 : index
    %0 = vector.load %arg0[%c0, %c0_0] : memref<8x128xf32, #tpu.memory_space<vmem>>, vector<8x128xf32>
    %c0_1 = arith.constant 0 : index
    %c0_2 = arith.constant 0 : index
    %1 = vector.load %arg1[%c0_1, %c0_2] : memref<128x128xf32, #tpu.memory_space<vmem>>, vector<128x128xf32>
    %c0_3 = arith.constant 0 : index
    %c0_4 = arith.constant 0 : index
    %2 = vector.load %arg2[%c0_3, %c0_4] : memref<1x128xf32, #tpu.memory_space<vmem>>, vector<1x128xf32>
    %cst = arith.constant dense<0.000000e+00> : vector<8x128xf32>
    %3 = tpu.matmul %0, %1, %cst {dimension_numbers = #tpu.dot_dimension_numbers<[1], [0], [0], [1], [0, 0, 1, 1], [], []>} : vector<8x128xf32>, vector<128x128xf32>, vector<8x128xf32> -> vector<8x128xf32>
    %4 = vector.broadcast %2 : vector<1x128xf32> to vector<8x128xf32>
    %5 = arith.addf %3, %4 : vector<8x128xf32>
    %cst_5 = arith.constant 0.000000e+00 : f32
    %6 = vector.broadcast %cst_5 : f32 to vector<8x128xf32>
    %7 = arith.cmpf ogt, %5, %6 : vector<8x128xf32>
    %cst_6 = arith.constant 1.000000e+00 : f32
    %8 = vector.broadcast %cst_6 : f32 to vector<8x128xf32>
    %9 = arith.mulf %5, %8 : vector<8x128xf32>
    %10 = math.exp %9 : vector<8x128xf32>
    %cst_7 = arith.constant 1.000000e+00 : f32
    %11 = vector.broadcast %cst_7 : f32 to vector<8x128xf32>
    %12 = arith.subf %10, %11 : vector<8x128xf32>
    %cst_8 = arith.constant 1.000000e+00 : f32
    %13 = vector.broadcast %cst_8 : f32 to vector<8x128xf32>
    %14 = arith.mulf %13, %12 : vector<8x128xf32>
    %15 = arith.select %7, %5, %14 : vector<8x128xi1>, vector<8x128xf32>
    %c0_9 = arith.constant 0 : index
    %c0_10 = arith.constant 0 : index
    %16 = vector.load %arg3[%c0_9, %c0_10] : memref<128x128xf32, #tpu.memory_space<vmem>>, vector<128x128xf32>
    %c0_11 = arith.constant 0 : index
    %c0_12 = arith.constant 0 : index
    %17 = vector.load %arg4[%c0_11, %c0_12] : memref<1x128xf32, #tpu.memory_space<vmem>>, vector<1x128xf32>
    %cst_13 = arith.constant dense<0.000000e+00> : vector<8x128xf32>
    %18 = tpu.matmul %15, %16, %cst_13 {dimension_numbers = #tpu.dot_dimension_numbers<[1], [0], [0], [1], [0, 0, 1, 1], [], []>} : vector<8x128xf32>, vector<128x128xf32>, vector<8x128xf32> -> vector<8x128xf32>
    %19 = vector.broadcast %17 : vector<1x128xf32> to vector<8x128xf32>
    %20 = arith.addf %18, %19 : vector<8x128xf32>
    %cst_14 = arith.constant 0.000000e+00 : f32
    %21 = vector.broadcast %cst_14 : f32 to vector<8x128xf32>
    %22 = arith.cmpf ogt, %20, %21 : vector<8x128xf32>
    %cst_15 = arith.constant 1.000000e+00 : f32
    %23 = vector.broadcast %cst_15 : f32 to vector<8x128xf32>
    %24 = arith.mulf %20, %23 : vector<8x128xf32>
    %25 = math.exp %24 : vector<8x128xf32>
    %cst_16 = arith.constant 1.000000e+00 : f32
    %26 = vector.broadcast %cst_16 : f32 to vector<8x128xf32>
    %27 = arith.subf %25, %26 : vector<8x128xf32>
    %cst_17 = arith.constant 1.000000e+00 : f32
    %28 = vector.broadcast %cst_17 : f32 to vector<8x128xf32>
    %29 = arith.mulf %28, %27 : vector<8x128xf32>
    %30 = arith.select %22, %20, %29 : vector<8x128xi1>, vector<8x128xf32>
    %c0_18 = arith.constant 0 : index
    %c0_19 = arith.constant 0 : index
    %31 = vector.load %arg5[%c0_18, %c0_19] : memref<128x128xf32, #tpu.memory_space<vmem>>, vector<128x128xf32>
    %c0_20 = arith.constant 0 : index
    %c0_21 = arith.constant 0 : index
    %32 = vector.load %arg6[%c0_20, %c0_21] : memref<1x128xf32, #tpu.memory_space<vmem>>, vector<1x128xf32>
    %cst_22 = arith.constant dense<0.000000e+00> : vector<8x128xf32>
    %33 = tpu.matmul %30, %31, %cst_22 {dimension_numbers = #tpu.dot_dimension_numbers<[1], [0], [0], [1], [0, 0, 1, 1], [], []>} : vector<8x128xf32>, vector<128x128xf32>, vector<8x128xf32> -> vector<8x128xf32>
    %34 = vector.broadcast %32 : vector<1x128xf32> to vector<8x128xf32>
    %35 = arith.addf %33, %34 : vector<8x128xf32>
    %c0_23 = arith.constant 0 : index
    %c0_24 = arith.constant 0 : index
    %36 = vector.load %arg7[%c0_23, %c0_24] : memref<8x128xf32, #tpu.memory_space<vmem>>, vector<8x128xf32>
    tpu.vector_store %arg7[%c0_23, %c0_24], %35 {strides = array<i32>} : memref<8x128xf32, #tpu.memory_space<vmem>>, vector<8x128xf32>,
    return
  }
}

</mosaic_0001>

<bundles_post_ra>
// kernel: tpu_custom_call.1
= control target key start
LH: loop header
LB: loop body
LE: loop exit
PB: predicated region body
PF: predicated region fallthrough
CT: control target
= control target key end

     0   :  { %12 = vsyncpa [#allocation3], 0  ;;  %s908_s0 = inlined_call_operand.hbm [shape: f32[8,128], index: 0, kind: input, shape index: {}]   ;;  %s909_s1 = inlined_call_operand.hbm [shape: f32[128,128], index: 1, kind: input, shape index: {}]   ;;  %s910_s2 = inlined_call_operand.vmem [shape: f32[1,128], index: 2, kind: input, shape index: {}]   ;;  %s911_s3 = inlined_call_operand.hbm [shape: f32[128,128], index: 3, kind: input, shape index: {}]   ;;  %s912_s4 = inlined_call_operand.vmem [shape: f32[1,128], index: 4, kind: input, shape index: {}]   ;;  %s913_s5 = inlined_call_operand.hbm [shape: f32[128,128], index: 5, kind: input, shape index: {}]   ;;  %s914_s6 = inlined_call_operand.vmem [shape: f32[1,128], index: 6, kind: input, shape index: {}]   ;;  %s915_s7 = inlined_call_operand.hbm [shape: f32[8,128], index: 7, kind: output, shape index: {}]  }
   0x1   :  { %13 = vsyncpa [#allocation6], 0 }
   0x2   :  { %14 = vsyncpa [#allocation9], 0 }
   0x3   :  { %15 = vsyncpa [#allocation4], 0  ;;  %s753_s24 = smov [#allocation5]   ;;  %s635_s28 = scalar_lea.hbm %s909_s1, 2048 }
   0x4   :  { %s31_s25 = sshll.u32 %s753_s24, 4  ;;  %p636_p0 = scmp.ne.s32.totalorder %s909_s1, %s635_s28  ;;  %s32_s25 = int_to_ptr.vmem [resolvable:$true] %s31_s25 }
   0x5   :  { %p639_p1 = scmp.lt.u32.totalorder %s635_s28, %s909_s1 }
   0x7   :  { %p641_p2 = pnand %p639_p1, %p636_p0 }
   0x9   :  { %644 = shalt.err (!%p641_p2)
}
   0xa   :  { %s645_s10 = scalar_lea.vmem %s32_s25, 2048  ;;  %p650_p4 = scmp.lt.s32.totalorder %s32_s25, %s32_s25 }
   0xb   :  { %p646_p3 = scmp.ne.s32.totalorder %s32_s25, %s645_s10  ;;  %p651_p5 = scmp.lt.s32.totalorder %s645_s10, %s645_s10 }
   0xd   :  { %p652_p6 = por %p651_p5, %p650_p4 }
   0xf   :  { %p653_p7 = pnand %p652_p6, %p646_p3 }
  0x11   :  { %656 = shalt.err (!%p653_p7)
}
  0x12   :  { %s754_s11 = smov 128   ;;  %s755_s12 = smov 8  }
  0x13   :  { %37 = dma.hbm_to_vmem [thread:$0]  %s909_s1, 2048, %s32_s25, [#allocation6], %s754_s11, %s754_s11, %s755_s12  }
  0x14   :  { %s756_s15 = smov [#allocation2]   ;;  %s757_s17 = smov [#allocation7]  }
  0x15   :  { %s22_s16 = sshll.u32 %s756_s15, 4  ;;  %s45_s18 = sshll.u32 %s757_s17, 4  ;;  %s23_s16 = int_to_ptr.vmem [resolvable:$true] %s22_s16  ;;  %s46_s18 = int_to_ptr.vmem [resolvable:$true] %s45_s18 }
  0x16   :  { %s657_s21 = scalar_lea.hbm %s908_s0, 128 }
  0x17   :  { %p658_p8 = scmp.ne.s32.totalorder %s908_s0, %s657_s21  ;;  %p661_p9 = scmp.lt.u32.totalorder %s657_s21, %s908_s0 }
  0x19   :  { %p663_p10 = pnand %p661_p9, %p658_p8 }
  0x1b   :  { %666 = shalt.err (!%p663_p10)
}
  0x1c   :  { %s667_s1 = scalar_lea.vmem %s23_s16, 128  ;;  %p672_p12 = scmp.lt.s32.totalorder %s23_s16, %s23_s16 }
  0x1d   :  { %p668_p11 = scmp.ne.s32.totalorder %s23_s16, %s667_s1  ;;  %p673_p13 = scmp.lt.s32.totalorder %s667_s1, %s667_s1 }
  0x1f   :  { %p674_p0 = por %p673_p13, %p672_p12 }
  0x21   :  { %p675_p1 = pnand %p674_p0, %p668_p11 }
  0x23   :  { %678 = shalt.err (!%p675_p1)
}
  0x24   :  { %25 = dma.hbm_to_vmem [thread:$0]  %s908_s0, 128, %s23_s16, [#allocation3]  }
  0x25   :  { %s679_s30 = scalar_lea.hbm %s911_s3, 2048 }
  0x26   :  { %p680_p2 = scmp.ne.s32.totalorder %s911_s3, %s679_s30  ;;  %p683_p3 = scmp.lt.u32.totalorder %s679_s30, %s911_s3 }
  0x28   :  { %p685_p4 = pnand %p683_p3, %p680_p2 }
  0x2a   :  { %688 = shalt.err (!%p685_p4)
}
  0x2b   :  { %s689_s14 = scalar_lea.vmem %s46_s18, 2048  ;;  %p694_p6 = scmp.lt.s32.totalorder %s46_s18, %s46_s18 }
  0x2c   :  { %p690_p5 = scmp.ne.s32.totalorder %s46_s18, %s689_s14  ;;  %p695_p7 = scmp.lt.s32.totalorder %s689_s14, %s689_s14 }
  0x2e   :  { %p696_p8 = por %p695_p7, %p694_p6 }
  0x30   :  { %p697_p9 = pnand %p696_p8, %p690_p5 }
  0x32   :  { %700 = shalt.err (!%p697_p9)
}
  0x33   :  { %51 = dma.hbm_to_vmem [thread:$0]  %s911_s3, 2048, %s46_s18, [#allocation6], %s754_s11, %s754_s11, %s755_s12  }
  0x34   :  { %s758_s16 = smov [#allocation8]   ;;  %s701_s21 = scalar_lea.hbm %s913_s5, 2048 }
  0x35   :  { %s59_s17 = sshll.u32 %s758_s16, 4  ;;  %p702_p10 = scmp.ne.s32.totalorder %s913_s5, %s701_s21  ;;  %s60_s17 = int_to_ptr.vmem [resolvable:$true] %s59_s17 }
  0x36   :  { %p705_p11 = scmp.lt.u32.totalorder %s701_s21, %s913_s5 }
  0x38   :  { %p707_p12 = pnand %p705_p11, %p702_p10 }
  0x3a   :  { %710 = shalt.err (!%p707_p12)
}
  0x3b   :  { %s711_s1 = scalar_lea.vmem %s60_s17, 2048  ;;  %p716_p0 = scmp.lt.s32.totalorder %s60_s17, %s60_s17 }
  0x3c   :  { %p712_p13 = scmp.ne.s32.totalorder %s60_s17, %s711_s1  ;;  %p717_p1 = scmp.lt.s32.totalorder %s711_s1, %s711_s1 }
  0x3e   :  { %p718_p2 = por %p717_p1, %p716_p0 }
  0x40   :  { %p719_p3 = pnand %p718_p2, %p712_p13 }
  0x42   :  { %722 = shalt.err (!%p719_p3)
}
  0x43   :  { %65 = dma.hbm_to_vmem [thread:$0]  %s913_s5, 2048, %s60_s17, [#allocation9], %s754_s11, %s754_s11, %s755_s12  }
  0x44   :  { %745 = dma.done.wait [#allocation3], 128  }
  0x45   :  { %746 = vsyncadd [#allocation3], 4294967168 }
  0x46   :  { %747 = dma.done.wait [#allocation6], 4096  }
  0x47   :  { %748 = vsyncadd [#allocation6], 4294963200 }
  0x48   :  { %749 = dma.done.wait [#allocation9], 2048  }
  0x49   :  { %750 = vsyncadd [#allocation9], 4294965248  ;;  %v759_v0 = vmov 0.0|0.0   ;;  %vm760_vm0 = vmmov 0   ;;  %v761_v1 = vmov 0.0   ;;  %v81_v2 = vld [vmem:[#allocation5] sm:$0xff] }
  0x4a   :  { %549 = vmatprep.subr.bf16.mxu0 %v759_v0  ;;  %476 = vmatprep.mubr.msk.f32.mxu0 %vm760_vm0, %v761_v1  ;;  %v82_v3 = vld [vmem:[#allocation5 + $0x8] sm:$0xff]  ;;  %v83_v4 = vld [vmem:[#allocation5 + $0x10] sm:$0xff]  ;;  %v84_v6 = vld [vmem:[#allocation5 + $0x18] sm:$0xff]  ;;  %s762_s28 = smov [#allocation10]  }
  0x4b   :  { %573 = vmatprep.subr.bf16.mxu1 %v759_v0  ;;  %511 = vmatprep.mubr.msk.f32.mxu1 %vm760_vm0, %v761_v1  ;;  %v550_v5 = vpack.c.bf16 %v82_v3, %v81_v2  ;;  %v553_v7 = vpack.c.bf16 %v84_v6, %v83_v4  ;;  %v85_v8 = vld [vmem:[#allocation5 + $0x20] sm:$0xff]  ;;  %v86_v9 = vld [vmem:[#allocation5 + $0x28] sm:$0xff]  ;;  %v181_v12 = vld [vmem:[#allocation7 + $0x10] sm:$0xff]  ;;  %s377_s29 = sshll.u32 %s762_s28, 4  ;;  %s378_s29 = int_to_ptr.vmem [resolvable:$true] %s377_s29 }
  0x4c   :  { %v179_v10 = vld [vmem:[#allocation7] sm:$0xff]  ;;  %v180_v11 = vld [vmem:[#allocation7 + $0x8] sm:$0xff]  ;;  %v182_v13 = vld [vmem:[#allocation7 + $0x18] sm:$0xff]  ;;  %v556_v14 = vpack.c.bf16 %v86_v9, %v85_v8  ;;  %p728_p5 = scmp.lt.s32.totalorder %s378_s29, %s378_s29 }
  0x4d   :  { %551 = vmatpush3.bf16.msra.mxu0 %v550_v5  ;;  %v574_v15 = vpack.c.bf16 %v180_v11, %v179_v10  ;;  %v87_v16 = vld [vmem:[#allocation5 + $0x30] sm:$0xff]  ;;  %v88_v17 = vld [vmem:[#allocation5 + $0x38] sm:$0xff]  ;;  %v577_v18 = vpack.c.bf16 %v182_v13, %v181_v12  ;;  %v183_v19 = vld [vmem:[#allocation7 + $0x20] sm:$0xff] }
  0x4e   :  { %552 = vmatprep.subr.bf16.mxu0 %v759_v0  ;;  %v184_v20 = vld [vmem:[#allocation7 + $0x28] sm:$0xff]  ;;  %v559_v21 = vpack.c.bf16 %v88_v17, %v87_v16  ;;  %v89_v22 = vld [vmem:[#allocation5 + $0x40] sm:$0xff]  ;;  %v91_v26 = vld [vmem:[#allocation5 + $0x50] sm:$0xff] }
  0x4f   :  { %575 = vmatpush3.bf16.msra.mxu1 %v574_v15  ;;  %v90_v23 = vld [vmem:[#allocation5 + $0x48] sm:$0xff]  ;;  %v580_v24 = vpack.c.bf16 %v184_v20, %v183_v19  ;;  %v92_v27 = vld [vmem:[#allocation5 + $0x58] sm:$0xff]  ;;  %v93_v29 = vld [vmem:[#allocation5 + $0x60] sm:$0xff] }
  0x50   :  { %576 = vmatprep.subr.bf16.mxu1 %v759_v0  ;;  %v562_v25 = vpack.c.bf16 %v90_v23, %v89_v22  ;;  %v565_v28 = vpack.c.bf16 %v92_v27, %v91_v26  ;;  %v94_v30 = vld [vmem:[#allocation5 + $0x68] sm:$0xff]  ;;  %v95_v32 = vld [vmem:[#allocation5 + $0x70] sm:$0xff]  ;;  %v96_v33 = vld [vmem:[#allocation5 + $0x78] sm:$0xff] }
  0x51   :  { %554 = vmatpush3.bf16.msra.mxu0 %v553_v7  ;;  %v568_v31 = vpack.c.bf16 %v94_v30, %v93_v29  ;;  %v571_v34 = vpack.c.bf16 %v96_v33, %v95_v32  ;;  %v80_v35 = vld [vmem:[#allocation2] sm:$0xff]  ;;  %v185_v36 = vld [vmem:[#allocation7 + $0x30] sm:$0xff]  ;;  %v187_v39 = vld [vmem:[#allocation7 + $0x40] sm:$0xff] }
  0x52   :  { %555 = vmatprep.subr.bf16.mxu0 %v759_v0  ;;  %v186_v37 = vld [vmem:[#allocation7 + $0x38] sm:$0xff]  ;;  %v188_v40 = vld [vmem:[#allocation7 + $0x48] sm:$0xff]  ;;  %v189_v42 = vld [vmem:[#allocation7 + $0x50] sm:$0xff] }
  0x53   :  { %578 = vmatpush3.bf16.msra.mxu1 %v577_v18  ;;  %v583_v38 = vpack.c.bf16 %v186_v37, %v185_v36  ;;  %v586_v41 = vpack.c.bf16 %v188_v40, %v187_v39  ;;  %v190_v43 = vld [vmem:[#allocation7 + $0x58] sm:$0xff]  ;;  %v191_v44 = vld [vmem:[#allocation7 + $0x60] sm:$0xff]  ;;  %v192_v46 = vld [vmem:[#allocation7 + $0x68] sm:$0xff] }
  0x54   :  { %579 = vmatprep.subr.bf16.mxu1 %v759_v0  ;;  %v589_v45 = vpack.c.bf16 %v190_v43, %v189_v42  ;;  %v592_v47 = vpack.c.bf16 %v192_v46, %v191_v44  ;;  %v193_v48 = vld [vmem:[#allocation7 + $0x70] sm:$0xff]  ;;  %v194_v49 = vld [vmem:[#allocation7 + $0x78] sm:$0xff]  ;;  %v277_v51 = vld [vmem:[#allocation8] sm:$0xff] }
  0x55   :  { %557 = vmatpush3.bf16.msra.mxu0 %v556_v14  ;;  %v595_v50 = vpack.c.bf16 %v194_v49, %v193_v48  ;;  %v278_v52 = vld [vmem:[#allocation8 + $0x8] sm:$0xff]  ;;  %v279_v53 = vld [vmem:[#allocation8 + $0x10] sm:$0xff]  ;;  %v280_v55 = vld [vmem:[#allocation8 + $0x18] sm:$0xff] }
  0x56   :  { %558 = vmatprep.subr.bf16.mxu0 %v759_v0  ;;  %v598_v54 = vpack.c.bf16 %v278_v52, %v277_v51  ;;  %v601_v56 = vpack.c.bf16 %v280_v55, %v279_v53  ;;  %v281_v57 = vld [vmem:[#allocation8 + $0x20] sm:$0xff]  ;;  %v282_v58 = vld [vmem:[#allocation8 + $0x28] sm:$0xff]  ;;  %v388_v60 = vld [vmem:[%s910_s2] ss:$0 sm:$0xff] }
  0x57   :  { %581 = vmatpush3.bf16.msra.mxu1 %v580_v24  ;;  %v604_v59 = vpack.c.bf16 %v282_v58, %v281_v57  ;;  %v283_v5 = vld [vmem:[#allocation8 + $0x30] sm:$0xff]  ;;  %v284_v6 = vld [vmem:[#allocation8 + $0x38] sm:$0xff]  ;;  %v285_v8 = vld [vmem:[#allocation8 + $0x40] sm:$0xff] }
  0x58   :  { %582 = vmatprep.subr.bf16.mxu1 %v759_v0  ;;  %v607_v7 = vpack.c.bf16 %v284_v6, %v283_v5  ;;  %v286_v9 = vld [vmem:[#allocation8 + $0x48] sm:$0xff]  ;;  %v287_v11 = vld [vmem:[#allocation8 + $0x50] sm:$0xff]  ;;  %v288_v12 = vld [vmem:[#allocation8 + $0x58] sm:$0xff] }
  0x59   :  { %560 = vmatpush3.bf16.msra.mxu0 %v559_v21  ;;  %v610_v10 = vpack.c.bf16 %v286_v9, %v285_v8  ;;  %v289_v13 = vld [vmem:[#allocation8 + $0x60] sm:$0xff]  ;;  %v613_v14 = vpack.c.bf16 %v288_v12, %v287_v11  ;;  %v290_v15 = vld [vmem:[#allocation8 + $0x68] sm:$0xff]  ;;  %v291_v17 = vld [vmem:[#allocation8 + $0x70] sm:$0xff] }
  0x5a   :  { %561 = vmatprep.subr.bf16.mxu0 %v759_v0  ;;  %v616_v16 = vpack.c.bf16 %v290_v15, %v289_v13  ;;  %v292_v18 = vld [vmem:[#allocation8 + $0x78] sm:$0xff] }
  0x5b   :  { %584 = vmatpush3.bf16.msra.mxu1 %v583_v38  ;;  %v619_v19 = vpack.c.bf16 %v292_v18, %v291_v17  ;;  %v390_v20 = vld [vmem:[%s912_s4] ss:$0 sm:$0xff]  ;;  %s723_s4 = scalar_lea.vmem %s378_s29, 128 }
  0x5c   :  { %585 = vmatprep.subr.bf16.mxu1 %v759_v0  ;;  %p724_p4 = scmp.ne.s32.totalorder %s378_s29, %s723_s4  ;;  %p729_p6 = scmp.lt.s32.totalorder %s723_s4, %s723_s4 }
  0x5d   :  { %563 = vmatpush3.bf16.msra.mxu0 %v562_v25 }
  0x5e   :  { %564 = vmatprep.subr.bf16.mxu0 %v759_v0  ;;  %p730_p7 = por %p729_p6, %p728_p5 }
  0x5f   :  { %587 = vmatpush3.bf16.msra.mxu1 %v586_v41 }
  0x60   :  { %588 = vmatprep.subr.bf16.mxu1 %v759_v0  ;;  %p731_p8 = pnand %p730_p7, %p724_p4 }
  0x61   :  { %566 = vmatpush3.bf16.msra.mxu0 %v565_v28  ;;  %v392_v28 = vld [vmem:[%s914_s6] ss:$0 sm:$0xff] }
  0x62   :  { %567 = vmatprep.subr.bf16.mxu0 %v759_v0 }
  0x63   :  { %590 = vmatpush3.bf16.msra.mxu1 %v589_v45 }
  0x64   :  { %591 = vmatprep.subr.bf16.mxu1 %v759_v0 }
  0x65   :  { %569 = vmatpush3.bf16.msra.mxu0 %v568_v31 }
  0x66   :  { %570 = vmatprep.subr.bf16.mxu0 %v759_v0 }
  0x67   :  { %593 = vmatpush3.bf16.msra.mxu1 %v592_v47 }
  0x68   :  { %594 = vmatprep.subr.bf16.mxu1 %v759_v0 }
  0x69   :  { %572 = vmatpush3.bf16.msra.mxu0 %v571_v34 }
  0x6a   :  { %597 = vmatprep.subr.bf16.mxu0 %v759_v0 }
  0x6b   :  { %596 = vmatpush3.bf16.msra.mxu1 %v595_v50 }
  0x6c   :  { %477 = vmatmul.mubr.f32.vlgmr.msra.gmra.mrb[0].mxu0 %v80_v35 }
  0x6d   :  { %546 = vmatprep.mubr.msk.f32.mxu0 %vm760_vm0, %v761_v1  ;;  %599 = vmatpush3.bf16.msra.mxu0 %v598_v54 }
  0x6e   :  { %600 = vmatprep.subr.bf16.mxu0 %v759_v0 }
  0x71   :  { %602 = vmatpush3.bf16.msra.mxu0 %v601_v56 }
  0x72   :  { %603 = vmatprep.subr.bf16.mxu0 %v759_v0 }
  0x75   :  { %605 = vmatpush3.bf16.msra.mxu0 %v604_v59 }
  0x76   :  { %606 = vmatprep.subr.bf16.mxu0 %v759_v0 }
  0x79   :  { %608 = vmatpush3.bf16.msra.mxu0 %v607_v7 }
  0x7a   :  { %609 = vmatprep.subr.bf16.mxu0 %v759_v0 }
  0x7d   :  { %611 = vmatpush3.bf16.msra.mxu0 %v610_v10 }
  0x7e   :  { %612 = vmatprep.subr.bf16.mxu0 %v759_v0 }
  0x81   :  { %614 = vmatpush3.bf16.msra.mxu0 %v613_v14 }
  0x82   :  { %615 = vmatprep.subr.bf16.mxu0 %v759_v0 }
  0x85   :  { %617 = vmatpush3.bf16.msra.mxu0 %v616_v16 }
  0x86   :  { %618 = vmatprep.subr.bf16.mxu0 %v759_v0 }
  0x89   :  { %620 = vmatpush3.bf16.msra.mxu0 %v619_v19 }
 0x13f   :  { %v170_v61 = vpop.f32.mrb[0].mxu0 }
 0x140   :  { %v171_v62 = vadd.f32 %v388_v60, %v170_v61  ;;  %v478_v63 = vpop.f32.mrb[1].mxu0 }
 0x142   :  { %v175_v1 = vmul.f32 1.442695, %v171_v62  ;;  %vm174_vm1 = vcmp.gt.f32.partialorder %v171_v62, 0.0 }
 0x144   :  { %631 = vpow2.f32 %v175_v1 }
 0x14e   :  { %v632_v2 = vpop.eup %631 }
 0x14f   :  { %v389_v3 = vadd.f32 -1.0, %v632_v2 }
 0x151   :  { %v178_v4 = vsel %vm174_vm1, %v171_v62, %v389_v3 }
 0x152   :  { %512 = vmatmul.mubr.f32.vlgmr.msra.gmra.mrb[0].mxu1 %v178_v4 }
 0x225   :  { %v268_v21 = vpop.f32.mrb[0].mxu1 }
 0x226   :  { %v269_v22 = vadd.f32 %v390_v20, %v268_v21  ;;  %v513_v23 = vpop.f32.mrb[1].mxu1 }
 0x228   :  { %v273_v24 = vmul.f32 1.442695, %v269_v22  ;;  %vm272_vm2 = vcmp.gt.f32.partialorder %v269_v22, 0.0 }
 0x22a   :  { %633 = vpow2.f32 %v273_v24 }
 0x234   :  { %v634_v25 = vpop.eup %633 }
 0x235   :  { %v391_v26 = vadd.f32 -1.0, %v634_v25 }
 0x237   :  { %v276_v27 = vsel %vm272_vm2, %v269_v22, %v391_v26 }
 0x238   :  { %547 = vmatmul.mubr.f32.vlgmr.msra.gmra.mrb[2].mxu0 %v276_v27 }
 0x30b   :  { %v366_v0 = vpop.f32.mrb[2].mxu0 }
 0x30c   :  { %v367_v29 = vadd.f32 %v392_v28, %v366_v0  ;;  %v548_v30 = vpop.f32.mrb[3].mxu0 }
 0x30e   :  { %370 = vst [vmem:[#allocation10] sm:$0xff] %v367_v29 }
 0x30f   :  { %734 = shalt.err (!%p731_p8)
}
 0x310   :  { %s735_s9 = scalar_lea.hbm %s915_s7, 128 }
 0x311   :  { %p736_p9 = scmp.ne.s32.totalorder %s915_s7, %s735_s9  ;;  %p739_p10 = scmp.lt.u32.totalorder %s735_s9, %s915_s7 }
 0x313   :  { %p741_p11 = pnand %p739_p10, %p736_p9 }
 0x315   :  { %744 = shalt.err (!%p741_p11)
}
 0x316   :  { %380 = dma.vmem_to_hbm [thread:$0]  %s378_s29, 128, %s915_s7, [#allocation4]  }
 0x317   :  { %751 = dma.done.wait [#allocation4], 128  }
 0x318   :  { %752 = vsyncadd [#allocation4], 4294967168 }
 0x319   :  { %384 = vsyncpa [#allocation3], 1 }
 0x31a   :  { %385 = vsyncpa [#allocation6], 1 }
 0x31b   :  { %386 = vsyncpa [#allocation9], 1 }
 0x31c   :  { %387 = vsyncpa [#allocation4], 1 }

</bundles_post_ra>
